<compile_context>
chip_gen: v6e
topology: v6e:2x2x1
jax: 0.10.0
libtpu: 0.0.40
codegen_flags: <defaults>
</compile_context>

<pallas_src>
import math
from functools import partial

import jax
import jax.numpy as jnp
from jax.experimental import pallas as pl
from jax.experimental.pallas import tpu as pltpu

_ACT_DTYPE = jnp.bfloat16          # inter-layer activation dtype
_VMEM_LIMIT = 40 * 1024 * 1024     # safe on v5e/v6e (128 MiB) and v7x (64 MiB)


def _round_up(x, m):
    return ((x + m - 1) // m) * m


def _pick_tm(rows, cap=256):
    """Row tile: bounded by `cap`, and split small problems in two for megacore."""
    if rows >= 2 * cap:
        return cap
    return max(8, _round_up((rows + 1) // 2, 8))


# ----------------------------------------------------------------------------
# Pallas kernels
# ----------------------------------------------------------------------------

def _conv3x3_kernel(x_ref, w_ref, b_ref, o_ref, *, wpad):
    """3x3 conv as 9 shifted bf16 matmuls over a flattened, zero-guarded input.

    x_ref : (rows_in, Cin)  full guarded flattened padded activation (resident)
    w_ref : (9, Cin, Cout)  taps (resident)
    b_ref : (1, Cout)       f32 bias
    o_ref : (tm, Cout)      one row tile of the padded-coordinate output
    """
    tm, cout = o_ref.shape
    guard = wpad + 1
    base = pl.multiple_of(pl.program_id(0) * tm, 8)
    # one aligned dynamic load of the halo'd window, then static in-VMEM shifts
    xwin = x_ref[pl.ds(base, tm + 2 * guard), :]
    acc = jnp.zeros((tm, cout), jnp.float32)
    for dy in range(3):
        for dx in range(3):
            off = dy * wpad + dx
            xs = xwin[off:off + tm, :]
            acc = acc + jnp.dot(xs, w_ref[dy * 3 + dx],
                                preferred_element_type=jnp.float32)
    o_ref[...] = (acc + b_ref[...]).astype(o_ref.dtype)


def _matmul_bias_kernel(x_ref, w_ref, b_ref, o_ref):
    """(tm, K) @ (K, N) + bias : 1x1 convs (channel_up)."""
    acc = jnp.dot(x_ref[...], w_ref[...], preferred_element_type=jnp.float32)
    o_ref[...] = (acc + b_ref[...]).astype(o_ref.dtype)


def _gn_normalize(x, gamma, beta, groups, eps):
    """GroupNorm(32, eps, affine) on one (HW, C) slab; stats in f32 on the MXU."""
    hw, c = x.shape
    cg = c // groups
    m_cg = (jax.lax.broadcasted_iota(jnp.int32, (c, groups), 0) // cg
            == jax.lax.broadcasted_iota(jnp.int32, (c, groups), 1)).astype(jnp.float32)
    m_gc = (jax.lax.broadcasted_iota(jnp.int32, (groups, c), 1) // cg
            == jax.lax.broadcasted_iota(jnp.int32, (groups, c), 0)).astype(jnp.float32)
    s = jnp.sum(x, axis=0, keepdims=True)          # (1, C)
    sq = jnp.sum(x * x, axis=0, keepdims=True)     # (1, C)
    n = float(hw * cg)
    mean_g = jnp.dot(s, m_cg, preferred_element_type=jnp.float32) / n
    msq_g = jnp.dot(sq, m_cg, preferred_element_type=jnp.float32) / n
    var_g = jnp.maximum(msq_g - mean_g * mean_g, 0.0)
    inv_g = jax.lax.rsqrt(var_g + eps)
    mean_c = jnp.dot(mean_g, m_gc, preferred_element_type=jnp.float32)
    inv_c = jnp.dot(inv_g, m_gc, preferred_element_type=jnp.float32)
    return (x - mean_c) * inv_c * gamma + beta


def _gn_swish_kernel(x_ref, g_ref, b_ref, o_ref, *, groups, eps, swish):
    x = x_ref[...].astype(jnp.float32)
    y = _gn_normalize(x, g_ref[...], b_ref[...], groups, eps)
    if swish:
        y = y * (1.0 / (1.0 + jnp.exp(-y)))
    o_ref[...] = y.astype(o_ref.dtype)


def _nonlocal_kernel(x_ref, g_ref, bt_ref, wqkv_ref, bqkv_ref, wp_ref, bp_ref,
                     o_ref, *, groups, eps, scale):
    """Fused NonLocalBlock for one batch element: GN + qkv + attention + proj + skip."""
    x = x_ref[...].astype(jnp.float32)                       # (HW, C)
    c = x.shape[1]
    hn = _gn_normalize(x, g_ref[...], bt_ref[...], groups, eps)
    qkv = jnp.dot(hn.astype(jnp.bfloat16), wqkv_ref[...],
                  preferred_element_type=jnp.float32) + bqkv_ref[...]
    q = qkv[:, :c].astype(jnp.bfloat16)
    k = qkv[:, c:2 * c].astype(jnp.bfloat16)
    v = qkv[:, 2 * c:].astype(jnp.bfloat16)
    s = jax.lax.dot_general(q, k, (((1,), (1,)), ((), ())),
                            preferred_element_type=jnp.float32) * scale
    s = s - jnp.max(s, axis=-1, keepdims=True)
    p = jnp.exp(s)
    p = p / jnp.sum(p, axis=-1, keepdims=True)
    a = jnp.dot(p.astype(jnp.bfloat16), v, preferred_element_type=jnp.float32)
    a = jnp.dot(a.astype(jnp.bfloat16), wp_ref[...],
                preferred_element_type=jnp.float32) + bp_ref[...]
    o_ref[...] = (x + a).astype(o_ref.dtype)


# ----------------------------------------------------------------------------
# Wrappers
# ----------------------------------------------------------------------------

@jax.jit
def conv3x3(x, w, b, skip=None):
    """3x3 / stride 1 / pad 1 conv. x: (B,H,W,Cin), w: (9,Cin,Cout) bf16, b: (1,Cout)."""
    bsz, h, wd, cin = x.shape
    cout = w.shape[-1]
    hp, wp = h + 2, wd + 2
    rows_out = bsz * hp * wp                      # outputs computed in padded coords
    tm = _pick_tm(rows_out)
    rows_out_p = _round_up(rows_out, tm)
    guard = wp + 1
    rows_in = _round_up(rows_out_p + 2 * guard, 8)

    xpad = jnp.pad(x.astype(_ACT_DTYPE), ((0, 0), (1, 1), (1, 1), (0, 0)))
    xflat = xpad.reshape(rows_out, cin)
    xflat = jnp.pad(xflat, ((guard, rows_in - guard - rows_out), (0, 0)))

    out = pl.pallas_call(
        partial(_conv3x3_kernel, wpad=wp),
        out_shape=jax.ShapeDtypeStruct((rows_out_p, cout), _ACT_DTYPE),
        grid=(rows_out_p // tm,),
        in_specs=[pl.BlockSpec((rows_in, cin), lambda i: (0, 0)),     # resident
                  pl.BlockSpec((9, cin, cout), lambda i: (0, 0, 0)),  # resident
                  pl.BlockSpec((1, cout), lambda i: (0, 0))],
        out_specs=pl.BlockSpec((tm, cout), lambda i: (i, 0)),
        compiler_params=pltpu.CompilerParams(
            dimension_semantics=("parallel",), vmem_limit_bytes=_VMEM_LIMIT),
    )(xflat, w, b)

    # drop the padded-coordinate border rows; fuse the residual add into this
    # XLA epilogue (no extra HBM round trip for a separate add kernel)
    y = out[:rows_out].reshape(bsz, hp, wp, cout)[:, 1:h + 1, 1:wd + 1, :]
    if skip is not None:
        y = y + skip
    return y


@jax.jit
def conv1x1(x, w, b):
    bsz, h, wd, cin = x.shape
    cout = w.shape[-1]
    rows = bsz * h * wd
    tm = _pick_tm(rows, cap=512)
    rows_p = _round_up(rows, tm)
    xflat = jnp.pad(x.astype(_ACT_DTYPE).reshape(rows, cin),
                    ((0, rows_p - rows), (0, 0)))
    out = pl.pallas_call(
        _matmul_bias_kernel,
        out_shape=jax.ShapeDtypeStruct((rows_p, cout), _ACT_DTYPE),
        grid=(rows_p // tm,),
        in_specs=[pl.BlockSpec((tm, cin), lambda i: (i, 0)),
                  pl.BlockSpec((cin, cout), lambda i: (0, 0)),
                  pl.BlockSpec((1, cout), lambda i: (0, 0))],
        out_specs=pl.BlockSpec((tm, cout), lambda i: (i, 0)),
        compiler_params=pltpu.CompilerParams(
            dimension_semantics=("parallel",), vmem_limit_bytes=_VMEM_LIMIT),
    )(xflat, w, b)
    return out[:rows].reshape(bsz, h, wd, cout)


@partial(jax.jit, static_argnames=("swish",))
def group_norm(x, gamma, beta, swish=False):
    bsz, h, wd, c = x.shape
    hw = h * wd
    out = pl.pallas_call(
        partial(_gn_swish_kernel, groups=32, eps=1e-6, swish=swish),
        out_shape=jax.ShapeDtypeStruct((bsz * hw, c), _ACT_DTYPE),
        grid=(bsz,),
        in_specs=[pl.BlockSpec((hw, c), lambda i: (i, 0)),
                  pl.BlockSpec((1, c), lambda i: (0, 0)),
                  pl.BlockSpec((1, c), lambda i: (0, 0))],
        out_specs=pl.BlockSpec((hw, c), lambda i: (i, 0)),
        compiler_params=pltpu.CompilerParams(
            dimension_semantics=("parallel",), vmem_limit_bytes=_VMEM_LIMIT),
    )(x.astype(_ACT_DTYPE).reshape(bsz * hw, c), gamma, beta)
    return out.reshape(bsz, h, wd, c)


@jax.jit
def nonlocal_block_fwd(x, p):
    bsz, h, wd, c = x.shape
    hw = h * wd
    scale = float(c) ** -0.5
    out = pl.pallas_call(
        partial(_nonlocal_kernel, groups=32, eps=1e-6, scale=scale),
        out_shape=jax.ShapeDtypeStruct((bsz * hw, c), _ACT_DTYPE),
        grid=(bsz,),
        in_specs=[pl.BlockSpec((hw, c), lambda i: (i, 0)),
                  pl.BlockSpec((1, c), lambda i: (0, 0)),
                  pl.BlockSpec((1, c), lambda i: (0, 0)),
                  pl.BlockSpec((c, 3 * c), lambda i: (0, 0)),
                  pl.BlockSpec((1, 3 * c), lambda i: (0, 0)),
                  pl.BlockSpec((c, c), lambda i: (0, 0)),
                  pl.BlockSpec((1, c), lambda i: (0, 0))],
        out_specs=pl.BlockSpec((hw, c), lambda i: (i, 0)),
        compiler_params=pltpu.CompilerParams(
            dimension_semantics=("parallel",), vmem_limit_bytes=_VMEM_LIMIT),
    )(x.astype(_ACT_DTYPE).reshape(bsz * hw, c),
      p["gn_gamma"], p["gn_beta"], p["wqkv"], p["bqkv"], p["wp"], p["bp"])
    return out.reshape(bsz, h, wd, c)


# ----------------------------------------------------------------------------
# Decoder blocks
# ----------------------------------------------------------------------------

def residual_block_fwd(x, p):
    h = group_norm(x, p["gn1_gamma"], p["gn1_beta"], swish=True)
    h = conv3x3(h, p["w1"], p["b1"])
    h = group_norm(h, p["gn2_gamma"], p["gn2_beta"], swish=True)
    skip = conv1x1(x, p["w_up"], p["b_up"]) if "w_up" in p else x
    return conv3x3(h, p["w2"], p["b2"], skip=skip)   # residual fused in epilogue


def upsample_block_fwd(x, p):
    # TODO(synk): nearest-x2 upsample (F.interpolate default) is pure data movement;
    # fusing the row//2, col//2 gather into the conv's index math would avoid this
    # HBM materialization — left as jnp.repeat glue for now.
    x = jnp.repeat(jnp.repeat(x, 2, axis=1), 2, axis=2)
    return conv3x3(x, p["w"], p["b"])


def decoder_forward(layers, x_nchw):
    x = jnp.transpose(x_nchw, (0, 2, 3, 1)).astype(_ACT_DTYPE)   # NCHW -> NHWC
    for kind, p in layers:
        if kind == "conv3":
            x = conv3x3(x, p["w"], p["b"])
        elif kind == "res":
            x = residual_block_fwd(x, p)
        elif kind == "nlb":
            x = nonlocal_block_fwd(x, p)
        elif kind == "up":
            x = upsample_block_fwd(x, p)
        elif kind == "gn_swish":
            x = group_norm(x, p["gamma"], p["beta"], swish=True)
        else:
            raise ValueError(kind)
    return jnp.transpose(x.astype(jnp.float32), (0, 3, 1, 2))    # NHWC -> NCHW


# ----------------------------------------------------------------------------
# Deterministic parameter initialization (mirrors Decoder.__init__)
# ----------------------------------------------------------------------------

class _KeyGen:
    def __init__(self, key):
        self._key = key

    def __call__(self):
        self._key, sub = jax.random.split(self._key)
        return sub


def _init_conv3(kg, cin, cout):
    w = (jax.random.normal(kg(), (9, cin, cout), jnp.float32)
         / math.sqrt(9 * cin)).astype(jnp.bfloat16)
    return {"w": w, "b": jnp.zeros((1, cout), jnp.float32)}


def _init_conv1(kg, cin, cout):
    w = (jax.random.normal(kg(), (cin, cout), jnp.float32)
         / math.sqrt(cin)).astype(jnp.bfloat16)
    return w, jnp.zeros((1, cout), jnp.float32)


def _init_gn(c):
    return jnp.ones((1, c), jnp.float32), jnp.zeros((1, c), jnp.float32)


def _init_res(kg, cin, cout):
    g1, b1 = _init_gn(cin)
    g2, b2 = _init_gn(cout)
    c1 = _init_conv3(kg, cin, cout)
    c2 = _init_conv3(kg, cout, cout)
    p = {"gn1_gamma": g1, "gn1_beta": b1, "w1": c1["w"], "b1": c1["b"],
         "gn2_gamma": g2, "gn2_beta": b2, "w2": c2["w"], "b2": c2["b"]}
    if cin != cout:
        p["w_up"], p["b_up"] = _init_conv1(kg, cin, cout)
    return p


def _init_nlb(kg, c):
    g, b = _init_gn(c)
    wq, bq = _init_conv1(kg, c, c)
    wk, bk = _init_conv1(kg, c, c)
    wv, bv = _init_conv1(kg, c, c)
    wp, bp = _init_conv1(kg, c, c)
    return {"gn_gamma": g, "gn_beta": b,
            "wqkv": jnp.concatenate([wq, wk, wv], axis=1),   # fused (C, 3C) projection
            "bqkv": jnp.concatenate([bq, bk, bv], axis=1),
            "wp": wp, "bp": bp}


def init_decoder(key, latent_dim, image_channels):
    """channels=[512,256,256,128,128], attn@16, 3 res blocks per stage — as in the module."""
    kg = _KeyGen(key)
    channels = [512, 256, 256, 128, 128]
    attn_resolutions = [16]
    num_res_blocks = 3
    resolution = 16
    in_ch = channels[0]
    layers = [("conv3", _init_conv3(kg, latent_dim, in_ch)),
              ("res", _init_res(kg, in_ch, in_ch)),
              ("nlb", _init_nlb(kg, in_ch)),
              ("res", _init_res(kg, in_ch, in_ch))]
    for i in range(len(channels)):
        out_ch = channels[i]
        for _ in range(num_res_blocks):
            layers.append(("res", _init_res(kg, in_ch, out_ch)))
            in_ch = out_ch
            if resolution in attn_resolutions:
                layers.append(("nlb", _init_nlb(kg, in_ch)))
        if i != 0:
            layers.append(("up", _init_conv3(kg, in_ch, in_ch)))
            resolution *= 2
    g, b = _init_gn(in_ch)
    layers.append(("gn_swish", {"gamma": g, "beta": b}))
    layers.append(("conv3", _init_conv3(kg, in_ch, image_channels)))
    return layers


# ----------------------------------------------------------------------------

if __name__ == "__main__":
    latent_dim, image_channels = 8, 3
    key = jax.random.PRNGKey(0)
    k_params, k_x = jax.random.split(key)
    params = init_decoder(k_params, latent_dim, image_channels)

    # small input: (batch, latent_dim, 4, 4); 4 UpSampleBlocks -> 64x64 output
    x = jax.random.normal(k_x, (2, latent_dim, 4, 4), jnp.float32)

    y = jax.block_until_ready(decoder_forward(params, x))
    assert y.shape == (2, image_channels, 64, 64), y.shape
    assert bool(jnp.all(jnp.isfinite(y)))
    print("KERNEL_OK")
</pallas_src>

<mosaic_0001>
module attributes {stable_mosaic.version = 11 : i64} {
  func.func @_conv3x3_kernel(%arg0: i32, %arg1: memref<96x8xbf16, #tpu.memory_space<vmem>>, %arg2: memref<9x8x512xbf16, #tpu.memory_space<vmem>>, %arg3: memref<1x512xf32, #tpu.memory_space<vmem>>, %arg4: memref<40x512xbf16, #tpu.memory_space<vmem>>) attributes {dimension_semantics = [#tpu.dimension_semantics<parallel>], iteration_bounds = array<i64: 2>, scalar_prefetch = 0 : i64, scratch_operands = 0 : i64, tpu.core_type = #tpu.core_type<tc>, window_params = [{pipeline_mode = #tpu.pipeline_mode<synchronous>, transform_indices = @transform_0, window_bounds = array<i64: 96, 8>}, {pipeline_mode = #tpu.pipeline_mode<synchronous>, transform_indices = @transform_1, window_bounds = array<i64: 9, 8, 512>}, {pipeline_mode = #tpu.pipeline_mode<synchronous>, transform_indices = @transform_2, window_bounds = array<i64: 1, 512>}, {transform_indices = @transform_3, window_bounds = array<i64: 40, 512>}]} {
    %c40_i32 = arith.constant 40 : i32
    %0 = arith.muli %arg0, %c40_i32 : i32
    %1 = tpu.assume_multiple %0, 8 : i32
    %2 = arith.index_cast %1 : i32 to index
    %c0 = arith.constant 0 : index
    %3 = vector.load %arg1[%2, %c0] : memref<96x8xbf16, #tpu.memory_space<vmem>>, vector<54x8xbf16>
    %cst = arith.constant 0.000000e+00 : f32
    %4 = vector.broadcast %cst : f32 to vector<40x512xf32>
    %5 = vector.extract_strided_slice %3 {offsets = [0, 0], sizes = [40, 8], strides = [1, 1]} : vector<54x8xbf16> to vector<40x8xbf16>
    %c0_0 = arith.constant 0 : index
    %c0_1 = arith.constant 0 : index
    %c0_2 = arith.constant 0 : index
    %6 = vector.load %arg2[%c0_0, %c0_1, %c0_2] : memref<9x8x512xbf16, #tpu.memory_space<vmem>>, vector<1x8x512xbf16>
    %7 = vector.shape_cast %6 : vector<1x8x512xbf16> to vector<8x512xbf16>
    %cst_3 = arith.constant dense<0.000000e+00> : vector<40x512xf32>
    %8 = tpu.matmul %5, %7, %cst_3 {dimension_numbers = #tpu.dot_dimension_numbers<[1], [0], [0], [1], [0, 0, 1, 1], [], []>} : vector<40x8xbf16>, vector<8x512xbf16>, vector<40x512xf32> -> vector<40x512xf32>
    %9 = arith.addf %4, %8 : vector<40x512xf32>
    %10 = vector.extract_strided_slice %3 {offsets = [1, 0], sizes = [40, 8], strides = [1, 1]} : vector<54x8xbf16> to vector<40x8xbf16>
    %c1 = arith.constant 1 : index
    %c0_4 = arith.constant 0 : index
    %c0_5 = arith.constant 0 : index
    %11 = vector.load %arg2[%c1, %c0_4, %c0_5] : memref<9x8x512xbf16, #tpu.memory_space<vmem>>, vector<1x8x512xbf16>
    %12 = vector.shape_cast %11 : vector<1x8x512xbf16> to vector<8x512xbf16>
    %cst_6 = arith.constant dense<0.000000e+00> : vector<40x512xf32>
    %13 = tpu.matmul %10, %12, %cst_6 {dimension_numbers = #tpu.dot_dimension_numbers<[1], [0], [0], [1], [0, 0, 1, 1], [], []>} : vector<40x8xbf16>, vector<8x512xbf16>, vector<40x512xf32> -> vector<40x512xf32>
    %14 = arith.addf %9, %13 : vector<40x512xf32>
    %15 = vector.extract_strided_slice %3 {offsets = [2, 0], sizes = [40, 8], strides = [1, 1]} : vector<54x8xbf16> to vector<40x8xbf16>
    %c2 = arith.constant 2 : index
    %c0_7 = arith.constant 0 : index
    %c0_8 = arith.constant 0 : index
    %16 = vector.load %arg2[%c2, %c0_7, %c0_8] : memref<9x8x512xbf16, #tpu.memory_space<vmem>>, vector<1x8x512xbf16>
    %17 = vector.shape_cast %16 : vector<1x8x512xbf16> to vector<8x512xbf16>
    %cst_9 = arith.constant dense<0.000000e+00> : vector<40x512xf32>
    %18 = tpu.matmul %15, %17, %cst_9 {dimension_numbers = #tpu.dot_dimension_numbers<[1], [0], [0], [1], [0, 0, 1, 1], [], []>} : vector<40x8xbf16>, vector<8x512xbf16>, vector<40x512xf32> -> vector<40x512xf32>
    %19 = arith.addf %14, %18 : vector<40x512xf32>
    %20 = vector.extract_strided_slice %3 {offsets = [6, 0], sizes = [40, 8], strides = [1, 1]} : vector<54x8xbf16> to vector<40x8xbf16>
    %c3 = arith.constant 3 : index
    %c0_10 = arith.constant 0 : index
    %c0_11 = arith.constant 0 : index
    %21 = vector.load %arg2[%c3, %c0_10, %c0_11] : memref<9x8x512xbf16, #tpu.memory_space<vmem>>, vector<1x8x512xbf16>
    %22 = vector.shape_cast %21 : vector<1x8x512xbf16> to vector<8x512xbf16>
    %cst_12 = arith.constant dense<0.000000e+00> : vector<40x512xf32>
    %23 = tpu.matmul %20, %22, %cst_12 {dimension_numbers = #tpu.dot_dimension_numbers<[1], [0], [0], [1], [0, 0, 1, 1], [], []>} : vector<40x8xbf16>, vector<8x512xbf16>, vector<40x512xf32> -> vector<40x512xf32>
    %24 = arith.addf %19, %23 : vector<40x512xf32>
    %25 = vector.extract_strided_slice %3 {offsets = [7, 0], sizes = [40, 8], strides = [1, 1]} : vector<54x8xbf16> to vector<40x8xbf16>
    %c4 = arith.constant 4 : index
    %c0_13 = arith.constant 0 : index
    %c0_14 = arith.constant 0 : index
    %26 = vector.load %arg2[%c4, %c0_13, %c0_14] : memref<9x8x512xbf16, #tpu.memory_space<vmem>>, vector<1x8x512xbf16>
    %27 = vector.shape_cast %26 : vector<1x8x512xbf16> to vector<8x512xbf16>
    %cst_15 = arith.constant dense<0.000000e+00> : vector<40x512xf32>
    %28 = tpu.matmul %25, %27, %cst_15 {dimension_numbers = #tpu.dot_dimension_numbers<[1], [0], [0], [1], [0, 0, 1, 1], [], []>} : vector<40x8xbf16>, vector<8x512xbf16>, vector<40x512xf32> -> vector<40x512xf32>
    %29 = arith.addf %24, %28 : vector<40x512xf32>
    %30 = vector.extract_strided_slice %3 {offsets = [8, 0], sizes = [40, 8], strides = [1, 1]} : vector<54x8xbf16> to vector<40x8xbf16>
    %c5 = arith.constant 5 : index
    %c0_16 = arith.constant 0 : index
    %c0_17 = arith.constant 0 : index
    %31 = vector.load %arg2[%c5, %c0_16, %c0_17] : memref<9x8x512xbf16, #tpu.memory_space<vmem>>, vector<1x8x512xbf16>
    %32 = vector.shape_cast %31 : vector<1x8x512xbf16> to vector<8x512xbf16>
    %cst_18 = arith.constant dense<0.000000e+00> : vector<40x512xf32>
    %33 = tpu.matmul %30, %32, %cst_18 {dimension_numbers = #tpu.dot_dimension_numbers<[1], [0], [0], [1], [0, 0, 1, 1], [], []>} : vector<40x8xbf16>, vector<8x512xbf16>, vector<40x512xf32> -> vector<40x512xf32>
    %34 = arith.addf %29, %33 : vector<40x512xf32>
    %35 = vector.extract_strided_slice %3 {offsets = [12, 0], sizes = [40, 8], strides = [1, 1]} : vector<54x8xbf16> to vector<40x8xbf16>
    %c6 = arith.constant 6 : index
    %c0_19 = arith.constant 0 : index
    %c0_20 = arith.constant 0 : index
    %36 = vector.load %arg2[%c6, %c0_19, %c0_20] : memref<9x8x512xbf16, #tpu.memory_space<vmem>>, vector<1x8x512xbf16>
    %37 = vector.shape_cast %36 : vector<1x8x512xbf16> to vector<8x512xbf16>
    %cst_21 = arith.constant dense<0.000000e+00> : vector<40x512xf32>
    %38 = tpu.matmul %35, %37, %cst_21 {dimension_numbers = #tpu.dot_dimension_numbers<[1], [0], [0], [1], [0, 0, 1, 1], [], []>} : vector<40x8xbf16>, vector<8x512xbf16>, vector<40x512xf32> -> vector<40x512xf32>
    %39 = arith.addf %34, %38 : vector<40x512xf32>
    %40 = vector.extract_strided_slice %3 {offsets = [13, 0], sizes = [40, 8], strides = [1, 1]} : vector<54x8xbf16> to vector<40x8xbf16>
    %c7 = arith.constant 7 : index
    %c0_22 = arith.constant 0 : index
    %c0_23 = arith.constant 0 : index
    %41 = vector.load %arg2[%c7, %c0_22, %c0_23] : memref<9x8x512xbf16, #tpu.memory_space<vmem>>, vector<1x8x512xbf16>
    %42 = vector.shape_cast %41 : vector<1x8x512xbf16> to vector<8x512xbf16>
    %cst_24 = arith.constant dense<0.000000e+00> : vector<40x512xf32>
    %43 = tpu.matmul %40, %42, %cst_24 {dimension_numbers = #tpu.dot_dimension_numbers<[1], [0], [0], [1], [0, 0, 1, 1], [], []>} : vector<40x8xbf16>, vector<8x512xbf16>, vector<40x512xf32> -> vector<40x512xf32>
    %44 = arith.addf %39, %43 : vector<40x512xf32>
    %45 = vector.extract_strided_slice %3 {offsets = [14, 0], sizes = [40, 8], strides = [1, 1]} : vector<54x8xbf16> to vector<40x8xbf16>
    %c8 = arith.constant 8 : index
    %c0_25 = arith.constant 0 : index
    %c0_26 = arith.constant 0 : index
    %46 = vector.load %arg2[%c8, %c0_25, %c0_26] : memref<9x8x512xbf16, #tpu.memory_space<vmem>>, vector<1x8x512xbf16>
    %47 = vector.shape_cast %46 : vector<1x8x512xbf16> to vector<8x512xbf16>
    %cst_27 = arith.constant dense<0.000000e+00> : vector<40x512xf32>
    %48 = tpu.matmul %45, %47, %cst_27 {dimension_numbers = #tpu.dot_dimension_numbers<[1], [0], [0], [1], [0, 0, 1, 1], [], []>} : vector<40x8xbf16>, vector<8x512xbf16>, vector<40x512xf32> -> vector<40x512xf32>
    %49 = arith.addf %44, %48 : vector<40x512xf32>
    %c0_28 = arith.constant 0 : index
    %c0_29 = arith.constant 0 : index
    %50 = vector.load %arg3[%c0_28, %c0_29] : memref<1x512xf32, #tpu.memory_space<vmem>>, vector<1x512xf32>
    %51 = vector.broadcast %50 : vector<1x512xf32> to vector<40x512xf32>
    %52 = arith.addf %49, %51 : vector<40x512xf32>
    %53 = arith.truncf %52 : vector<40x512xf32> to vector<40x512xbf16>
    %c0_30 = arith.constant 0 : index
    %c0_31 = arith.constant 0 : index
    %54 = vector.load %arg4[%c0_30, %c0_31] : memref<40x512xbf16, #tpu.memory_space<vmem>>, vector<40x512xbf16>
    tpu.vector_store %arg4[%c0_30, %c0_31], %53 {strides = array<i32>} : memref<40x512xbf16, #tpu.memory_space<vmem>>, vector<40x512xbf16>,
    return
  }
  func.func @transform_0(%arg0: i32) -> (i32, i32) {
    %c0_i32 = arith.constant 0 : i32
    %c0_i32_0 = arith.constant 0 : i32
    %c0_i32_1 = arith.constant 0 : i32
    return %c0_i32, %c0_i32_0 : i32, i32
  }
  func.func @transform_1(%arg0: i32) -> (i32, i32, i32) {
    %c0_i32 = arith.constant 0 : i32
    %c0_i32_0 = arith.constant 0 : i32
    %c0_i32_1 = arith.constant 0 : i32
    %c0_i32_2 = arith.constant 0 : i32
    return %c0_i32, %c0_i32_0, %c0_i32_1 : i32, i32, i32
  }
  func.func @transform_2(%arg0: i32) -> (i32, i32) {
    %c0_i32 = arith.constant 0 : i32
    %c0_i32_0 = arith.constant 0 : i32
    %c0_i32_1 = arith.constant 0 : i32
    return %c0_i32, %c0_i32_0 : i32, i32
  }
  func.func @transform_3(%arg0: i32) -> (i32, i32) {
    %c0_i32 = arith.constant 0 : i32
    %c0_i32_0 = arith.constant 0 : i32
    return %arg0, %c0_i32 : i32, i32
  }
}

</mosaic_0001>

<bundles_post_ra>
// kernel: conv3x3.1
= control target key start
LH: loop header
LB: loop body
LE: loop exit
PB: predicated region body
PF: predicated region fallthrough
CT: control target
= control target key end

     0   :  { %s2224_s12 = smov 0   ;;  %s2800_s0 = inlined_call_operand.vmem [shape: bf16[96,8], index: 0, kind: input, shape index: {}]   ;;  %s2801_s1 = inlined_call_operand.vmem [shape: bf16[9,8,512], index: 1, kind: input, shape index: {}]   ;;  %s2802_s2 = inlined_call_operand.vmem [shape: f32[1,512], index: 2, kind: input, shape index: {}]   ;;  %s2803_s3 = inlined_call_operand.vmem [shape: bf16[80,512], index: 3, kind: output, shape index: {}]  }
   0x1 LB: > { %s1980_s13 = sadd.s32 4294967295, %s2201_s12   ;;  %p1983_p0 = scmp.ge.s32.totalorder %s2201_s12, 1  ;;  %s2201_s12 = sphi %s2224_s12, %s13_s12  }
   0x2   : > { %p127_p1 = scmp.lt.s32.totalorder %s2201_s12, 3 }
   0x4   : > { %p128_p2 = pnand %p1983_p0, %p127_p1 }
   0x6   : > { %131 = sbr.rel (%p128_p2) target bundleno = 436 (0x1b4), region = 32 }
   0xb   : > { %v1987_v0 = vld [vmem:[%s2801_s1 + $0x10] sm:$0xff]  ;;  %vm231_vm0 = vcmask 1043456   ;;  %v1988_v1 = vld [vmem:[%s2801_s1 + $0x18] sm:$0xff]  ;;  %v167_v2 = vld [vmem:[%s2801_s1] sm:$0xff]  ;;  %s155_s20 = smul.u32 40, %s1980_s13  ;;  %v2203_v7 = vmov 0  }
   0xc   : > { %v1993_v3 = vcombine.high %v1987_v0, %v1987_v0  ;;  %v1995_v4 = vcombine.high %v1988_v1, %v1988_v1  ;;  %v1992_v5 = vcombine.low %v1987_v0, %v1987_v0  ;;  %v1994_v6 = vcombine.low %v1988_v1, %v1988_v1  ;;  %276 = vmatprep.mubr.bf16.mxu0 %v2203_v7  ;;  %v168_v8 = vld [vmem:[%s2801_s1 + $0x8] sm:$0xff]  ;;  %v2282_v24 = vld [vmem:[%s2801_s1 + $0x20] sm:$0xff]  ;;  %s147_s4 = smul.u32 5, %s1980_s13 }
   0xd   : > { %337 = vmatprep.mubr.bf16.mxu1 %v2203_v7  ;;  %v2006_v9 = vcombine.high %v167_v2, %v167_v2  ;;  %v2008_v10 = vcombine.high %v168_v8, %v168_v8  ;;  %s156_s23 = sshra.s32 %s155_s20, 3  ;;  %v2005_v26 = vcombine.low %v167_v2, %v167_v2  ;;  %v2007_v27 = vcombine.low %v168_v8, %v168_v8  ;;  %v2288_v28 = vld [vmem:[%s2801_s1 + $0x28] sm:$0xff]  ;;  %v2031_v2 = vld [vmem:[%s2801_s1 + $0x30] sm:$0xff] }
   0xe   : > { %1996 = vmatprep.subr.msk.bf16.mxu0 %vm231_vm0, %v1993_v3  ;;  %2000 = vmatprep.subr.msk.bf16.mxu1 %vm231_vm0, %v1995_v4  ;;  %v233_v11 = vsel %vm231_vm0, %v1992_v5, 0  ;;  %v239_v12 = vsel %vm231_vm0, %v1994_v6, 0  ;;  %s1986_s24 = sshll.u32 %s156_s23, 2  ;;  %vm187_vm1 = vsmask.f32 7424  ;;  %vm221_vm2 = vcmask 64512  }
   0xf   : > { %259 = vmatpush1.bf16.msra.mxu0 %v233_v11  ;;  %320 = vmatpush1.bf16.msra.mxu1 %v239_v12  ;;  %s2255_s27 = scalar_lea.vmem %s2800_s0, %s1986_s24  ;;  %v2020_v31 = vcombine.high %v2282_v24, %v2282_v24  ;;  %v2022_v35 = vcombine.high %v2288_v28, %v2288_v28  ;;  %v385_v38 = vsel %vm231_vm0, %v2005_v26, 0  ;;  %v391_v39 = vsel %vm231_vm0, %v2007_v27, 0  ;;  %v2032_v3 = vld [vmem:[%s2801_s1 + $0x38] sm:$0xff]  ;;  %p148_p3 = scmp.lt.s32.totalorder %s147_s4, 9 }
  0x10   : > { %2009 = vmatprep.subr.msk.bf16.mxu0 %vm231_vm0, %v2006_v9  ;;  %2013 = vmatprep.subr.msk.bf16.mxu1 %vm231_vm0, %v2008_v10  ;;  %v160_v13 = vld [vmem:[%s2255_s27] sm:$0xf]  ;;  %v161_v14 = vld [vmem:[%s2255_s27 + $0x4] sm:$0xf]  ;;  %v162_v15 = vld [vmem:[%s2255_s27 + $0x8] sm:$0xf]  ;;  %v2019_v62 = vcombine.low %v2282_v24, %v2282_v24  ;;  %v2021_v63 = vcombine.low %v2288_v28, %v2288_v28  ;;  %v2034_v9 = vcombine.high %v2031_v2, %v2031_v2 }
  0x11   : > { %v163_v16 = vld [vmem:[%s2255_s27 + $0xc] sm:$0xf]  ;;  %v2263_v17 = vcombine.low %v160_v13, %v161_v14  ;;  %v2266_v18 = vld [vmem:[%s2255_s27 + $0x10] sm:$0xf]  ;;  %v2271_v20 = vld [vmem:[%s2255_s27 + $0x14] sm:$0xf]  ;;  %v2321_v57 = vcombine.low %v161_v14, %v162_v15  ;;  %v2036_v10 = vcombine.high %v2032_v3, %v2032_v3  ;;  %v2035_v26 = vcombine.low %v2032_v3, %v2032_v3 }
  0x12   : > { %v2268_v19 = vcombine.low %v162_v15, %v163_v16  ;;  %v2277_v23 = vcombine.low %v2266_v18, %v2271_v20  ;;  %vm703_vm3 = vcmask 1044480   ;;  %vm885_vm4 = vsmask.f32 4352  ;;  %v166_v0 = vld [vmem:[%s2255_s27 + $0x18] sm:$0x7]  ;;  %s2831_s4 = smov (!%p148_p3, %s147_s4), 9 }
  0x13   : > { %v189_v21 = vshrl.u32 %v2263_v17, 16  ;;  %v191_v22 = vshll.u32 %v2263_v17, 16  ;;  %v704_v43 = vrot.slane %v2263_v17, 3  ;;  %v2326_v59 = vcombine.low %v163_v16, %v2266_v18  ;;  %s2131_s13 = sshll.u32 %s2831_s4, 4 }
  0x14   : > { %v196_v25 = vshll.u32 %v2268_v19, 16  ;;  %v200_v33 = vshrl.u32 %v2268_v19, 16  ;;  %v204_v34 = vshll.u32 %v2277_v23, 16  ;;  %v705_v44 = vrot.slane %v2268_v19, 3  ;;  %s2749_s9 = scalar_lea.vmem %s2803_s3, %s2131_s13 }
  0x15   : > { %v193_v29 = vrot.slane %v191_v22, 1  ;;  %v886_v36 = vrot.slane %v189_v21, 3  ;;  %v887_v37 = vrot.slane %v191_v22, 4  ;;  %v2304_v47 = vrot.slane %v2277_v23, 3 }
  0x16   : > { %v198_v30 = vrot.slane %v196_v25, 1  ;;  %v890_v41 = vrot.slane %v196_v25, 4  ;;  %v889_v42 = vrot.slane %v200_v33, 3  ;;  %v206_v46 = vrot.slane %v204_v34, 1 }
  0x17   : > { %v194_v32 = vor.u32 %v193_v29, %v189_v21  ;;  %v208_v48 = vshrl.u32 %v2277_v23, 16  ;;  %v2310_v49 = vsel %vm703_vm3, %v704_v43, %v705_v44  ;;  %v888_v50 = vor.u32 %v887_v37, %v886_v36 }
  0x18   : > { %v202_v45 = vor.u32 %v200_v33, %v198_v30  ;;  %v2316_v51 = vsel %vm703_vm3, %v705_v44, %v2304_v47  ;;  %v891_v52 = vor.u32 %v890_v41, %v889_v42  ;;  %v894_v54 = vrot.slane %v204_v34, 4  ;;  %v2060_v41 = vld [vmem:[%s2801_s1 + $0x58] sm:$0xff] }
  0x19   : > { %v199_v40 = vsel %vm187_vm1, %v194_v32, %v198_v30  ;;  %v893_v53 = vrot.slane %v208_v48, 3  ;;  %v210_v61 = vor.u32 %v208_v48, %v206_v46  ;;  %v2345_v1 = vcombine.low %v2271_v20, %v166_v0 }
  0x1a   : > { %1997 = vmatmul.mubr.msk.bf16.vlgmr.msra.gmra.mxu0 %vm221_vm2, %v199_v40  ;;  %2001 = vmatmul.mubr.msk.bf16.vlgmr.msra.gmra.mxu1 %vm221_vm2, %v199_v40  ;;  %v207_v55 = vsel %vm187_vm1, %v202_v45, %v206_v46  ;;  %v2319_v56 = vsel %vm885_vm4, %v888_v50, %v891_v52  ;;  %v1257_v4 = vrot.slane %v2326_v59, 2  ;;  %v547_v6 = vsel %vm231_vm0, %v2019_v62, 0  ;;  %v2059_v40 = vld [vmem:[%s2801_s1 + $0x50] sm:$0xff] }
  0x1b   : > { %411 = vmatpush1.bf16.msra.mxu0 %v385_v38  ;;  %472 = vmatpush1.bf16.msra.mxu1 %v391_v39  ;;  %v2323_v58 = vor.u32 %v894_v54, %v893_v53  ;;  %v2355_v5 = vrot.slane %v2345_v1, 2  ;;  %v553_v8 = vsel %vm231_vm0, %v2021_v63, 0  ;;  %vm1255_vm5 = vcmask 1045504   ;;  %v2077_v53 = vld [vmem:[%s2801_s1 + $0x68] sm:$0xff]  ;;  %v2092_v63 = vld [vmem:[%s2801_s1 + $0x78] sm:$0xff] }
  0x1c   : > { %286 = vmatprep.mubr.bf16.mxu0 %v2203_v7  ;;  %347 = vmatprep.mubr.bf16.mxu1 %v2203_v7  ;;  %v2004_v12 = vcombine.low %v2266_v18, %v2266_v18  ;;  %v1445_v13 = vshrl.u32 %v2326_v59, 16  ;;  %v1448_v14 = vshll.u32 %v2326_v59, 16  ;;  %v522_v15 = vrot.slane %v2263_v17, 1 }
  0x1d   : > { %2023 = vmatprep.subr.msk.bf16.mxu0 %vm231_vm0, %v2020_v31  ;;  %2027 = vmatprep.subr.msk.bf16.mxu1 %vm231_vm0, %v2022_v35  ;;  %v2331_v60 = vsel %vm885_vm4, %v891_v52, %v2323_v58  ;;  %v2363_v11 = vsel %vm1255_vm5, %v1257_v4, %v2355_v5  ;;  %v523_v16 = vrot.slane %v2268_v19, 1  ;;  %v1454_v18 = vshrl.u32 %v2345_v1, 16 }
  0x1e   : > { %v1447_v21 = vrot.slane %v1445_v13, 2  ;;  %v1450_v22 = vrot.slane %v1448_v14, 3  ;;  %v1457_v24 = vshll.u32 %v2345_v1, 16  ;;  %vm521_vm6 = vcmask 1046528  }
  0x1f   : > { %v2033_v25 = vcombine.low %v2031_v2, %v2031_v2  ;;  %v1456_v27 = vrot.slane %v1454_v18, 2  ;;  %v524_v29 = vsel %vm521_vm6, %v522_v15, %v523_v16  ;;  %v735_v33 = vsel %vm231_vm0, %v2035_v26, 0 }
  0x20   : > { %v1459_v28 = vrot.slane %v1457_v24, 3  ;;  %v2398_v30 = vor.u32 %v1450_v22, %v1447_v21  ;;  %vm1437_vm7 = vsmask.f32 5376  ;;  %v525_v37 = vrot.slane %v2277_v23, 1 }
  0x21   : > { %v729_v32 = vsel %vm231_vm0, %v2033_v25, 0  ;;  %v1639_v42 = vrot.slane %v2326_v59, 3  ;;  %v2433_v43 = vrot.slane %v2345_v1, 3  ;;  %v2065_v46 = vcombine.high %v2059_v40, %v2059_v40 }
  0x22   : > { %1998 = vmatmul.mubr.msk.bf16.gmra.mxu0 %vm221_vm2, %v207_v55  ;;  %2002 = vmatmul.mubr.msk.bf16.gmra.mxu1 %vm221_vm2, %v207_v55  ;;  %v2400_v31 = vor.u32 %v1459_v28, %v1456_v27  ;;  %v526_v38 = vsel %vm521_vm6, %v523_v16, %v525_v37  ;;  %v2067_v48 = vcombine.high %v2060_v41, %v2060_v41  ;;  %v1441_v21 = vshll.u32 %v2321_v57, 16 }
  0x23   : > { %296 = vmatprep.mubr.bf16.mxu0 %v2203_v7  ;;  %357 = vmatprep.mubr.bf16.mxu1 %v2203_v7  ;;  %v2441_v50 = vsel %vm703_vm3, %v1639_v42, %v2433_v43  ;;  %v2066_v52 = vcombine.low %v2060_v41, %v2060_v41  ;;  %v2081_v62 = vcombine.low %v2077_v53, %v2077_v53 }
  0x24   : > { %v2407_v36 = vsel %vm1437_vm7, %v2398_v30, %v2400_v31  ;;  %v2063_v3 = vcombine.low %v2271_v20, %v2271_v20  ;;  %v2106_v20 = vld [vmem:[%s2801_s1 + $0x88] sm:$0xff]  ;;  %v1443_v18 = vrot.slane %v1441_v21, 3 }
  0x25   : > { %v1102_v55 = vsel %vm231_vm0, %v2066_v52, 0  ;;  %v1287_v1 = vsel %vm231_vm0, %v2081_v62, 0  ;;  %v2110_v16 = vcombine.high %v2106_v20, %v2106_v20  ;;  %v2109_v25 = vcombine.low %v2106_v20, %v2106_v20 }
  0x27   : > { %v1669_v28 = vsel %vm231_vm0, %v2109_v25, 0 }
  0x2a   : > { %1999 = vmatmul.mubr.msk.bf16.gmra.mxu0 %vm221_vm2, %v210_v61  ;;  %2003 = vmatmul.mubr.msk.bf16.gmra.mxu1 %vm221_vm2, %v210_v61 }
  0x2b   : > { %428 = vmatprep.mubr.bf16.mxu0 %v2203_v7  ;;  %489 = vmatprep.mubr.bf16.mxu1 %v2203_v7 }
  0x32   : > { %2010 = vmatmul.mubr.msk.bf16.vlgmr.msra.gmra.mxu0 %vm221_vm2, %v2263_v17  ;;  %2014 = vmatmul.mubr.msk.bf16.vlgmr.msra.gmra.mxu1 %vm221_vm2, %v2263_v17  ;;  %v2045_v17 = vld [vmem:[%s2801_s1 + $0x40] sm:$0xff] }
  0x33   : > { %573 = vmatpush1.bf16.msra.mxu0 %v547_v6  ;;  %634 = vmatpush1.bf16.msra.mxu1 %v553_v8  ;;  %v2048_v34 = vcombine.high %v2045_v17, %v2045_v17  ;;  %v2047_v23 = vcombine.low %v2045_v17, %v2045_v17  ;;  %v1256_v6 = vrot.slane %v2321_v57, 2 }
  0x34   : > { %438 = vmatprep.mubr.bf16.mxu0 %v2203_v7  ;;  %499 = vmatprep.mubr.bf16.mxu1 %v2203_v7 }
  0x35   : > { %2037 = vmatprep.subr.msk.bf16.mxu0 %vm231_vm0, %v2034_v9  ;;  %2041 = vmatprep.subr.msk.bf16.mxu1 %vm231_vm0, %v2036_v10  ;;  %v917_v44 = vsel %vm231_vm0, %v2047_v23, 0  ;;  %v2095_v9 = vcombine.low %v2092_v63, %v2092_v63  ;;  %v2105_v10 = vld [vmem:[%s2801_s1 + $0x80] sm:$0xff] }
  0x36   : > { %v2108_v15 = vcombine.high %v2105_v10, %v2105_v10  ;;  %v2107_v24 = vcombine.low %v2105_v10, %v2105_v10 }
  0x37   : > { %v1488_v14 = vsel %vm231_vm0, %v2095_v9, 0 }
  0x38   : > { %v1663_v27 = vsel %vm231_vm0, %v2107_v24, 0 }
  0x3a   : > { %2011 = vmatmul.mubr.msk.bf16.gmra.mxu0 %vm221_vm2, %v2268_v19  ;;  %2015 = vmatmul.mubr.msk.bf16.gmra.mxu1 %vm221_vm2, %v2268_v19  ;;  %v2046_v19 = vld [vmem:[%s2801_s1 + $0x48] sm:$0xff] }
  0x3b   : > { %448 = vmatprep.mubr.bf16.mxu0 %v2203_v7  ;;  %509 = vmatprep.mubr.bf16.mxu1 %v2203_v7  ;;  %v2050_v35 = vcombine.high %v2046_v19, %v2046_v19  ;;  %v2049_v39 = vcombine.low %v2046_v19, %v2046_v19 }
  0x3d   : > { %v923_v45 = vsel %vm231_vm0, %v2049_v39, 0 }
  0x42   : > { %2012 = vmatmul.mubr.msk.bf16.gmra.mxu0 %vm221_vm2, %v2004_v12  ;;  %2016 = vmatmul.mubr.msk.bf16.gmra.mxu1 %vm221_vm2, %v2004_v12  ;;  %v1258_v12 = vsel %vm1255_vm5, %v1256_v6, %v1257_v4  ;;  %v1438_v4 = vshrl.u32 %v2321_v57, 16 }
  0x43   : > { %590 = vmatprep.mubr.bf16.mxu0 %v2203_v7  ;;  %651 = vmatprep.mubr.bf16.mxu1 %v2203_v7 }
  0x44   : > { %v1440_v22 = vrot.slane %v1438_v4, 2 }
  0x4a   : > { %2024 = vmatmul.mubr.msk.bf16.vlgmr.msra.gmra.mxu0 %vm221_vm2, %v524_v29  ;;  %2028 = vmatmul.mubr.msk.bf16.vlgmr.msra.gmra.mxu1 %vm221_vm2, %v524_v29 }
  0x4b   : > { %755 = vmatpush1.bf16.msra.mxu0 %v729_v32  ;;  %816 = vmatpush1.bf16.msra.mxu1 %v735_v33 }
  0x4c   : > { %600 = vmatprep.mubr.bf16.mxu0 %v2203_v7  ;;  %661 = vmatprep.mubr.bf16.mxu1 %v2203_v7 }
  0x4d   : > { %2051 = vmatprep.subr.msk.bf16.mxu0 %vm231_vm0, %v2048_v34  ;;  %2055 = vmatprep.subr.msk.bf16.mxu1 %vm231_vm0, %v2050_v35 }
  0x52   : > { %2025 = vmatmul.mubr.msk.bf16.gmra.mxu0 %vm221_vm2, %v526_v38  ;;  %2029 = vmatmul.mubr.msk.bf16.gmra.mxu1 %vm221_vm2, %v526_v38 }
  0x53   : > { %610 = vmatprep.mubr.bf16.mxu0 %v2203_v7  ;;  %671 = vmatprep.mubr.bf16.mxu1 %v2203_v7 }
  0x5a   : > { %2026 = vmatmul.mubr.msk.bf16.gmra.mxu0 %vm221_vm2, %v525_v37  ;;  %2030 = vmatmul.mubr.msk.bf16.gmra.mxu1 %vm221_vm2, %v525_v37 }
  0x5b   : > { %772 = vmatprep.mubr.bf16.mxu0 %v2203_v7  ;;  %833 = vmatprep.mubr.bf16.mxu1 %v2203_v7 }
  0x62   : > { %2038 = vmatmul.mubr.msk.bf16.vlgmr.msra.gmra.mxu0 %vm221_vm2, %v2310_v49  ;;  %2042 = vmatmul.mubr.msk.bf16.vlgmr.msra.gmra.mxu1 %vm221_vm2, %v2310_v49  ;;  %v2064_v49 = vcombine.low %v2059_v40, %v2059_v40 }
  0x63   : > { %943 = vmatpush1.bf16.msra.mxu0 %v917_v44  ;;  %1004 = vmatpush1.bf16.msra.mxu1 %v923_v45 }
  0x64   : > { %782 = vmatprep.mubr.bf16.mxu0 %v2203_v7  ;;  %843 = vmatprep.mubr.bf16.mxu1 %v2203_v7  ;;  %v1096_v54 = vsel %vm231_vm0, %v2064_v49, 0 }
  0x65   : > { %2068 = vmatprep.subr.msk.bf16.mxu0 %vm231_vm0, %v2065_v46  ;;  %2072 = vmatprep.subr.msk.bf16.mxu1 %vm231_vm0, %v2067_v48 }
  0x6a   : > { %2039 = vmatmul.mubr.msk.bf16.gmra.mxu0 %vm221_vm2, %v2316_v51  ;;  %2043 = vmatmul.mubr.msk.bf16.gmra.mxu1 %vm221_vm2, %v2316_v51  ;;  %v2076_v51 = vld [vmem:[%s2801_s1 + $0x60] sm:$0xff] }
  0x6b   : > { %792 = vmatprep.mubr.bf16.mxu0 %v2203_v7  ;;  %853 = vmatprep.mubr.bf16.mxu1 %v2203_v7  ;;  %v2080_v61 = vcombine.high %v2076_v51, %v2076_v51 }
  0x72   : > { %2040 = vmatmul.mubr.msk.bf16.gmra.mxu0 %vm221_vm2, %v2304_v47  ;;  %2044 = vmatmul.mubr.msk.bf16.gmra.mxu1 %vm221_vm2, %v2304_v47  ;;  %v2082_v47 = vcombine.high %v2077_v53, %v2077_v53 }
  0x73   : > { %960 = vmatprep.mubr.bf16.mxu0 %v2203_v7  ;;  %1021 = vmatprep.mubr.bf16.mxu1 %v2203_v7 }
  0x7a   : > { %2052 = vmatmul.mubr.msk.bf16.vlgmr.msra.gmra.mxu0 %vm221_vm2, %v2319_v56  ;;  %2056 = vmatmul.mubr.msk.bf16.vlgmr.msra.gmra.mxu1 %vm221_vm2, %v2319_v56  ;;  %v2079_v56 = vcombine.low %v2076_v51, %v2076_v51 }
  0x7b   : > { %1122 = vmatpush1.bf16.msra.mxu0 %v1096_v54  ;;  %1183 = vmatpush1.bf16.msra.mxu1 %v1102_v55 }
  0x7c   : > { %970 = vmatprep.mubr.bf16.mxu0 %v2203_v7  ;;  %1031 = vmatprep.mubr.bf16.mxu1 %v2203_v7  ;;  %v1281_v0 = vsel %vm231_vm0, %v2079_v56, 0 }
  0x7d   : > { %2083 = vmatprep.subr.msk.bf16.mxu0 %vm231_vm0, %v2080_v61  ;;  %2087 = vmatprep.subr.msk.bf16.mxu1 %vm231_vm0, %v2082_v47 }
  0x82   : > { %2053 = vmatmul.mubr.msk.bf16.gmra.mxu0 %vm221_vm2, %v2331_v60  ;;  %2057 = vmatmul.mubr.msk.bf16.gmra.mxu1 %vm221_vm2, %v2331_v60  ;;  %v2091_v60 = vld [vmem:[%s2801_s1 + $0x70] sm:$0xff] }
  0x83   : > { %980 = vmatprep.mubr.bf16.mxu0 %v2203_v7  ;;  %1041 = vmatprep.mubr.bf16.mxu1 %v2203_v7  ;;  %v2094_v2 = vcombine.high %v2091_v60, %v2091_v60  ;;  %v2093_v8 = vcombine.low %v2091_v60, %v2091_v60 }
  0x85   : > { %v1482_v13 = vsel %vm231_vm0, %v2093_v8, 0 }
  0x8a   : > { %2054 = vmatmul.mubr.msk.bf16.gmra.mxu0 %vm221_vm2, %v2323_v58  ;;  %2058 = vmatmul.mubr.msk.bf16.gmra.mxu1 %vm221_vm2, %v2323_v58  ;;  %v2096_v58 = vcombine.high %v2092_v63, %v2092_v63 }
  0x8b   : > { %1139 = vmatprep.mubr.bf16.mxu0 %v2203_v7  ;;  %1200 = vmatprep.mubr.bf16.mxu1 %v2203_v7 }
  0x92   : > { %2069 = vmatmul.mubr.msk.bf16.vlgmr.msra.gmra.mxu0 %vm221_vm2, %v2321_v57  ;;  %2073 = vmatmul.mubr.msk.bf16.vlgmr.msra.gmra.mxu1 %vm221_vm2, %v2321_v57 }
  0x93   : > { %1307 = vmatpush1.bf16.msra.mxu0 %v1281_v0  ;;  %1368 = vmatpush1.bf16.msra.mxu1 %v1287_v1 }
  0x94   : > { %1149 = vmatprep.mubr.bf16.mxu0 %v2203_v7  ;;  %1210 = vmatprep.mubr.bf16.mxu1 %v2203_v7 }
  0x95   : > { %2097 = vmatprep.subr.msk.bf16.mxu0 %vm231_vm0, %v2094_v2  ;;  %2101 = vmatprep.subr.msk.bf16.mxu1 %vm231_vm0, %v2096_v58 }
  0x9a   : > { %2070 = vmatmul.mubr.msk.bf16.gmra.mxu0 %vm221_vm2, %v2326_v59  ;;  %2074 = vmatmul.mubr.msk.bf16.gmra.mxu1 %vm221_vm2, %v2326_v59 }
  0x9b   : > { %1159 = vmatprep.mubr.bf16.mxu0 %v2203_v7  ;;  %1220 = vmatprep.mubr.bf16.mxu1 %v2203_v7 }
  0xa2   : > { %2071 = vmatmul.mubr.msk.bf16.gmra.mxu0 %vm221_vm2, %v2063_v3  ;;  %2075 = vmatmul.mubr.msk.bf16.gmra.mxu1 %vm221_vm2, %v2063_v3 }
  0xa3   : > { %1324 = vmatprep.mubr.bf16.mxu0 %v2203_v7  ;;  %1385 = vmatprep.mubr.bf16.mxu1 %v2203_v7 }
  0xaa   : > { %2084 = vmatmul.mubr.msk.bf16.vlgmr.msra.gmra.mxu0 %vm221_vm2, %v1258_v12  ;;  %2088 = vmatmul.mubr.msk.bf16.vlgmr.msra.gmra.mxu1 %vm221_vm2, %v1258_v12 }
  0xab   : > { %1508 = vmatpush1.bf16.msra.mxu0 %v1482_v13  ;;  %1569 = vmatpush1.bf16.msra.mxu1 %v1488_v14 }
  0xac   : > { %1334 = vmatprep.mubr.bf16.mxu0 %v2203_v7  ;;  %1395 = vmatprep.mubr.bf16.mxu1 %v2203_v7 }
  0xad   : > { %2111 = vmatprep.subr.msk.bf16.mxu0 %vm231_vm0, %v2108_v15  ;;  %2115 = vmatprep.subr.msk.bf16.mxu1 %vm231_vm0, %v2110_v16 }
  0xb2   : > { %2085 = vmatmul.mubr.msk.bf16.gmra.mxu0 %vm221_vm2, %v2363_v11  ;;  %2089 = vmatmul.mubr.msk.bf16.gmra.mxu1 %vm221_vm2, %v2363_v11  ;;  %v1444_v11 = vor.u32 %v1443_v18, %v1440_v22 }
  0xb3   : > { %1344 = vmatprep.mubr.bf16.mxu0 %v2203_v7  ;;  %1405 = vmatprep.mubr.bf16.mxu1 %v2203_v7 }
  0xb4   : > { %v1452_v26 = vsel %vm1437_vm7, %v1444_v11, %v2398_v30 }
  0xba   : > { %2086 = vmatmul.mubr.msk.bf16.gmra.mxu0 %vm221_vm2, %v2355_v5  ;;  %2090 = vmatmul.mubr.msk.bf16.gmra.mxu1 %vm221_vm2, %v2355_v5  ;;  %v1638_v5 = vrot.slane %v2321_v57, 3 }
  0xbb   : > { %1525 = vmatprep.mubr.bf16.mxu0 %v2203_v7  ;;  %1586 = vmatprep.mubr.bf16.mxu1 %v2203_v7 }
  0xbc   : > { %v1640_v17 = vsel %vm703_vm3, %v1638_v5, %v1639_v42 }
  0xc2   : > { %2098 = vmatmul.mubr.msk.bf16.vlgmr.msra.gmra.mxu0 %vm221_vm2, %v1452_v26  ;;  %2102 = vmatmul.mubr.msk.bf16.vlgmr.msra.gmra.mxu1 %vm221_vm2, %v1452_v26 }
  0xc3   : > { %1689 = vmatpush1.bf16.msra.mxu0 %v1663_v27  ;;  %1750 = vmatpush1.bf16.msra.mxu1 %v1669_v28 }
  0xc4   : > { %1535 = vmatprep.mubr.bf16.mxu0 %v2203_v7  ;;  %1596 = vmatprep.mubr.bf16.mxu1 %v2203_v7 }
  0xca   : > { %2099 = vmatmul.mubr.msk.bf16.gmra.mxu0 %vm221_vm2, %v2407_v36  ;;  %2103 = vmatmul.mubr.msk.bf16.gmra.mxu1 %vm221_vm2, %v2407_v36 }
  0xcb   : > { %1545 = vmatprep.mubr.bf16.mxu0 %v2203_v7  ;;  %1606 = vmatprep.mubr.bf16.mxu1 %v2203_v7 }
  0xd2   : > { %2100 = vmatmul.mubr.msk.bf16.gmra.mxu0 %vm221_vm2, %v2400_v31  ;;  %2104 = vmatmul.mubr.msk.bf16.gmra.mxu1 %vm221_vm2, %v2400_v31 }
  0xd3   : > { %1706 = vmatprep.mubr.bf16.mxu0 %v2203_v7  ;;  %1767 = vmatprep.mubr.bf16.mxu1 %v2203_v7 }
  0xda   : > { %v278_v19 = vpop.f32.mrf.mxu0  ;;  %v339_v29 = vpop.f32.mrf.mxu1  ;;  %2112 = vmatmul.mubr.msk.bf16.vlgmr.msra.gmra.mxu0 %vm221_vm2, %v1640_v17  ;;  %2116 = vmatmul.mubr.msk.bf16.vlgmr.msra.gmra.mxu1 %vm221_vm2, %v1640_v17 }
  0xdb   : > { %1716 = vmatprep.mubr.bf16.mxu0 %v2203_v7  ;;  %1777 = vmatprep.mubr.bf16.mxu1 %v2203_v7 }
  0xdc   : > { %v280_v30 = vpop.f32.mrf.mxu0  ;;  %v341_v31 = vpop.f32.mrf.mxu1 }
  0xde   : > { %v282_v32 = vpop.f32.mrf.mxu0  ;;  %v343_v33 = vpop.f32.mrf.mxu1 }
  0xe0   : > { %v284_v34 = vpop.f32.mrf.mxu0  ;;  %v345_v57 = vpop.f32.mrf.mxu1 }
  0xe2   : > { %v288_v35 = vpop.f32.mrf.mxu0  ;;  %v349_v59 = vpop.f32.mrf.mxu1  ;;  %2113 = vmatmul.mubr.msk.bf16.gmra.mxu0 %vm221_vm2, %v2441_v50  ;;  %2117 = vmatmul.mubr.msk.bf16.gmra.mxu1 %vm221_vm2, %v2441_v50 }
  0xe3   : > { %1726 = vmatprep.mubr.bf16.mxu0 %v2203_v7  ;;  %1787 = vmatprep.mubr.bf16.mxu1 %v2203_v7 }
  0xe4   : > { %v290_v36 = vpop.f32.mrf.mxu0  ;;  %v351_v37 = vpop.f32.mrf.mxu1 }
  0xe6   : > { %v292_v38 = vpop.f32.mrf.mxu0  ;;  %v353_v23 = vpop.f32.mrf.mxu1 }
  0xe8   : > { %v294_v39 = vpop.f32.mrf.mxu0  ;;  %v355_v40 = vpop.f32.mrf.mxu1 }
  0xea   : > { %v298_v41 = vpop.f32.mrf.mxu0  ;;  %v359_v42 = vpop.f32.mrf.mxu1  ;;  %2114 = vmatmul.mubr.msk.bf16.gmra.mxu0 %vm221_vm2, %v2433_v43  ;;  %2118 = vmatmul.mubr.msk.bf16.gmra.mxu1 %vm221_vm2, %v2433_v43 }
  0xec   : > { %v300_v44 = vpop.f32.mrf.mxu0  ;;  %v361_v45 = vpop.f32.mrf.mxu1 }
  0xee   : > { %v302_v46 = vpop.f32.mrf.mxu0  ;;  %v363_v48 = vpop.f32.mrf.mxu1 }
  0xf0   : > { %v303_v50 = vpop.f32.mrf.mxu0  ;;  %v364_v7 = vpop.f32.mrf.mxu1 }
  0xf2   : > { %v430_v49 = vpop.f32.mrf.mxu0  ;;  %v491_v52 = vpop.f32.mrf.mxu1 }
  0xf3   : > { %v431_v51 = vadd.f32 %v430_v49, %v278_v19  ;;  %v492_v53 = vadd.f32 %v491_v52, %v339_v29 }
  0xf4   : > { %v432_v54 = vpop.f32.mrf.mxu0  ;;  %v493_v55 = vpop.f32.mrf.mxu1 }
  0xf5   : > { %v433_v61 = vadd.f32 %v432_v54, %v280_v30  ;;  %v494_v47 = vadd.f32 %v493_v55, %v341_v31 }
  0xf6   : > { %v434_v56 = vpop.f32.mrf.mxu0  ;;  %v495_v62 = vpop.f32.mrf.mxu1 }
  0xf7   : > { %v435_v60 = vadd.f32 %v434_v56, %v282_v32  ;;  %v496_v63 = vadd.f32 %v495_v62, %v343_v33 }
  0xf8   : > { %v436_v0 = vpop.f32.mrf.mxu0  ;;  %v497_v43 = vpop.f32.mrf.mxu1 }
  0xf9   : > { %v437_v1 = vadd.f32 %v436_v0, %v284_v34  ;;  %v498_v2 = vadd.f32 %v497_v43, %v345_v57 }
  0xfa   : > { %v440_v58 = vpop.f32.mrf.mxu0  ;;  %v501_v3 = vpop.f32.mrf.mxu1 }
  0xfb   : > { %v441_v6 = vadd.f32 %v440_v58, %v288_v35  ;;  %v502_v8 = vadd.f32 %v501_v3, %v349_v59 }
  0xfc   : > { %v442_v9 = vpop.f32.mrf.mxu0  ;;  %v503_v10 = vpop.f32.mrf.mxu1 }
  0xfd   : > { %v443_v20 = vadd.f32 %v442_v9, %v290_v36  ;;  %v504_v12 = vadd.f32 %v503_v10, %v351_v37 }
  0xfe   : > { %v444_v13 = vpop.f32.mrf.mxu0  ;;  %v505_v14 = vpop.f32.mrf.mxu1 }
  0xff   : > { %v445_v15 = vadd.f32 %v444_v13, %v292_v38  ;;  %v506_v16 = vadd.f32 %v505_v14, %v353_v23 }
 0x100   : > { %v446_v4 = vpop.f32.mrf.mxu0  ;;  %v507_v21 = vpop.f32.mrf.mxu1 }
 0x101   : > { %v447_v22 = vadd.f32 %v446_v4, %v294_v39  ;;  %v508_v18 = vadd.f32 %v507_v21, %v355_v40 }
 0x102   : > { %v450_v11 = vpop.f32.mrf.mxu0  ;;  %v511_v24 = vpop.f32.mrf.mxu1 }
 0x103   : > { %v451_v25 = vadd.f32 %v450_v11, %v298_v41  ;;  %v512_v26 = vadd.f32 %v511_v24, %v359_v42 }
 0x104   : > { %v452_v27 = vpop.f32.mrf.mxu0  ;;  %v513_v28 = vpop.f32.mrf.mxu1 }
 0x105   : > { %v453_v5 = vadd.f32 %v452_v27, %v300_v44  ;;  %v514_v17 = vadd.f32 %v513_v28, %v361_v45 }
 0x106   : > { %v454_v19 = vpop.f32.mrf.mxu0  ;;  %v515_v29 = vpop.f32.mrf.mxu1 }
 0x108   : > { %v455_v30 = vpop.f32.mrf.mxu0  ;;  %v516_v31 = vpop.f32.mrf.mxu1 }
 0x10a   : > { %v592_v32 = vpop.f32.mrf.mxu0  ;;  %v653_v33 = vpop.f32.mrf.mxu1 }
 0x10b   : > { %v680_v34 = vadd.f32 %v592_v32, %v431_v51  ;;  %v682_v57 = vadd.f32 %v653_v33, %v492_v53 }
 0x10c   : > { %v594_v35 = vpop.f32.mrf.mxu0  ;;  %v655_v59 = vpop.f32.mrf.mxu1 }
 0x10d   : > { %v681_v36 = vadd.f32 %v594_v35, %v433_v61  ;;  %v683_v37 = vadd.f32 %v655_v59, %v494_v47 }
 0x10e   : > { %v596_v38 = vpop.f32.mrf.mxu0  ;;  %v657_v23 = vpop.f32.mrf.mxu1 }
 0x10f   : > { %v684_v39 = vadd.f32 %v596_v38, %v435_v60  ;;  %v686_v40 = vadd.f32 %v657_v23, %v496_v63 }
 0x110   : > { %v598_v41 = vpop.f32.mrf.mxu0  ;;  %v659_v42 = vpop.f32.mrf.mxu1 }
 0x111   : > { %v685_v44 = vadd.f32 %v598_v41, %v437_v1  ;;  %v687_v45 = vadd.f32 %v659_v42, %v498_v2 }
 0x112   : > { %v602_v46 = vpop.f32.mrf.mxu0  ;;  %v663_v48 = vpop.f32.mrf.mxu1 }
 0x113   : > { %v688_v50 = vadd.f32 %v602_v46, %v441_v6  ;;  %v690_v7 = vadd.f32 %v663_v48, %v502_v8 }
 0x114   : > { %v604_v49 = vpop.f32.mrf.mxu0  ;;  %v665_v52 = vpop.f32.mrf.mxu1 }
 0x115   : > { %v689_v51 = vadd.f32 %v604_v49, %v443_v20  ;;  %v691_v53 = vadd.f32 %v665_v52, %v504_v12 }
 0x116   : > { %v606_v54 = vpop.f32.mrf.mxu0  ;;  %v667_v55 = vpop.f32.mrf.mxu1 }
 0x117   : > { %v692_v61 = vadd.f32 %v606_v54, %v445_v15  ;;  %v694_v47 = vadd.f32 %v667_v55, %v506_v16 }
 0x118   : > { %v608_v56 = vpop.f32.mrf.mxu0  ;;  %v669_v62 = vpop.f32.mrf.mxu1 }
 0x119   : > { %v693_v60 = vadd.f32 %v608_v56, %v447_v22  ;;  %v695_v63 = vadd.f32 %v669_v62, %v508_v18 }
 0x11a   : > { %v612_v0 = vpop.f32.mrf.mxu0  ;;  %v673_v43 = vpop.f32.mrf.mxu1 }
 0x11b   : > { %v696_v1 = vadd.f32 %v612_v0, %v451_v25  ;;  %v698_v2 = vadd.f32 %v673_v43, %v512_v26 }
 0x11c   : > { %v614_v58 = vpop.f32.mrf.mxu0  ;;  %v675_v3 = vpop.f32.mrf.mxu1 }
 0x11d   : > { %v697_v6 = vadd.f32 %v614_v58, %v453_v5  ;;  %v699_v8 = vadd.f32 %v675_v3, %v514_v17 }
 0x11e   : > { %v616_v9 = vpop.f32.mrf.mxu0  ;;  %v677_v10 = vpop.f32.mrf.mxu1 }
 0x120   : > { %v617_v20 = vpop.f32.mrf.mxu0  ;;  %v678_v12 = vpop.f32.mrf.mxu1 }
 0x122   : > { %v774_v13 = vpop.f32.mrf.mxu0  ;;  %v835_v14 = vpop.f32.mrf.mxu1 }
 0x123   : > { %v862_v15 = vadd.f32 %v774_v13, %v680_v34  ;;  %v864_v16 = vadd.f32 %v835_v14, %v682_v57 }
 0x124   : > { %v776_v4 = vpop.f32.mrf.mxu0  ;;  %v837_v21 = vpop.f32.mrf.mxu1 }
 0x125   : > { %v863_v22 = vadd.f32 %v776_v4, %v681_v36  ;;  %v865_v18 = vadd.f32 %v837_v21, %v683_v37 }
 0x126   : > { %v778_v11 = vpop.f32.mrf.mxu0  ;;  %v839_v24 = vpop.f32.mrf.mxu1 }
 0x127   : > { %v866_v25 = vadd.f32 %v778_v11, %v684_v39  ;;  %v868_v26 = vadd.f32 %v839_v24, %v686_v40 }
 0x128   : > { %v780_v27 = vpop.f32.mrf.mxu0  ;;  %v841_v28 = vpop.f32.mrf.mxu1 }
 0x129   : > { %v867_v5 = vadd.f32 %v780_v27, %v685_v44  ;;  %v869_v17 = vadd.f32 %v841_v28, %v687_v45 }
 0x12a   : > { %v784_v19 = vpop.f32.mrf.mxu0  ;;  %v845_v29 = vpop.f32.mrf.mxu1 }
 0x12b   : > { %v870_v30 = vadd.f32 %v784_v19, %v688_v50  ;;  %v872_v31 = vadd.f32 %v845_v29, %v690_v7 }
 0x12c   : > { %v786_v32 = vpop.f32.mrf.mxu0  ;;  %v847_v33 = vpop.f32.mrf.mxu1 }
 0x12d   : > { %v871_v34 = vadd.f32 %v786_v32, %v689_v51  ;;  %v873_v57 = vadd.f32 %v847_v33, %v691_v53 }
 0x12e   : > { %v788_v35 = vpop.f32.mrf.mxu0  ;;  %v849_v59 = vpop.f32.mrf.mxu1 }
 0x12f   : > { %v874_v36 = vadd.f32 %v788_v35, %v692_v61  ;;  %v876_v37 = vadd.f32 %v849_v59, %v694_v47 }
 0x130   : > { %v790_v38 = vpop.f32.mrf.mxu0  ;;  %v851_v23 = vpop.f32.mrf.mxu1 }
 0x131   : > { %v875_v39 = vadd.f32 %v790_v38, %v693_v60  ;;  %v877_v40 = vadd.f32 %v851_v23, %v695_v63 }
 0x132   : > { %v794_v41 = vpop.f32.mrf.mxu0  ;;  %v855_v42 = vpop.f32.mrf.mxu1 }
 0x133   : > { %v878_v44 = vadd.f32 %v794_v41, %v696_v1  ;;  %v880_v45 = vadd.f32 %v855_v42, %v698_v2 }
 0x134   : > { %v796_v46 = vpop.f32.mrf.mxu0  ;;  %v857_v48 = vpop.f32.mrf.mxu1 }
 0x135   : > { %v879_v50 = vadd.f32 %v796_v46, %v697_v6  ;;  %v881_v7 = vadd.f32 %v857_v48, %v699_v8 }
 0x136   : > { %v798_v49 = vpop.f32.mrf.mxu0  ;;  %v859_v52 = vpop.f32.mrf.mxu1 }
 0x138   : > { %v799_v51 = vpop.f32.mrf.mxu0  ;;  %v860_v53 = vpop.f32.mrf.mxu1 }
 0x13a   : > { %v962_v54 = vpop.f32.mrf.mxu0  ;;  %v1023_v55 = vpop.f32.mrf.mxu1 }
 0x13b   : > { %v1050_v61 = vadd.f32 %v962_v54, %v862_v15  ;;  %v1052_v47 = vadd.f32 %v1023_v55, %v864_v16 }
 0x13c   : > { %v964_v56 = vpop.f32.mrf.mxu0  ;;  %v1025_v62 = vpop.f32.mrf.mxu1 }
 0x13d   : > { %v1051_v60 = vadd.f32 %v964_v56, %v863_v22  ;;  %v1053_v63 = vadd.f32 %v1025_v62, %v865_v18 }
 0x13e   : > { %v966_v0 = vpop.f32.mrf.mxu0  ;;  %v1027_v43 = vpop.f32.mrf.mxu1 }
 0x13f   : > { %v1054_v1 = vadd.f32 %v966_v0, %v866_v25  ;;  %v1056_v2 = vadd.f32 %v1027_v43, %v868_v26 }
 0x140   : > { %v968_v58 = vpop.f32.mrf.mxu0  ;;  %v1029_v3 = vpop.f32.mrf.mxu1 }
 0x141   : > { %v1055_v6 = vadd.f32 %v968_v58, %v867_v5  ;;  %v1057_v8 = vadd.f32 %v1029_v3, %v869_v17 }
 0x142   : > { %v972_v9 = vpop.f32.mrf.mxu0  ;;  %v1033_v10 = vpop.f32.mrf.mxu1 }
 0x143   : > { %v1058_v20 = vadd.f32 %v972_v9, %v870_v30  ;;  %v1060_v12 = vadd.f32 %v1033_v10, %v872_v31 }
 0x144   : > { %v974_v13 = vpop.f32.mrf.mxu0  ;;  %v1035_v14 = vpop.f32.mrf.mxu1 }
 0x145   : > { %v1059_v15 = vadd.f32 %v974_v13, %v871_v34  ;;  %v1061_v16 = vadd.f32 %v1035_v14, %v873_v57 }
 0x146   : > { %v976_v4 = vpop.f32.mrf.mxu0  ;;  %v1037_v21 = vpop.f32.mrf.mxu1 }
 0x147   : > { %v1062_v22 = vadd.f32 %v976_v4, %v874_v36  ;;  %v1064_v18 = vadd.f32 %v1037_v21, %v876_v37 }
 0x148   : > { %v978_v11 = vpop.f32.mrf.mxu0  ;;  %v1039_v24 = vpop.f32.mrf.mxu1 }
 0x149   : > { %v1063_v25 = vadd.f32 %v978_v11, %v875_v39  ;;  %v1065_v26 = vadd.f32 %v1039_v24, %v877_v40 }
 0x14a   : > { %v982_v27 = vpop.f32.mrf.mxu0  ;;  %v1043_v28 = vpop.f32.mrf.mxu1 }
 0x14b   : > { %v1066_v5 = vadd.f32 %v982_v27, %v878_v44  ;;  %v1068_v17 = vadd.f32 %v1043_v28, %v880_v45 }
 0x14c   : > { %v984_v19 = vpop.f32.mrf.mxu0  ;;  %v1045_v29 = vpop.f32.mrf.mxu1 }
 0x14d   : > { %v1067_v30 = vadd.f32 %v984_v19, %v879_v50  ;;  %v1069_v31 = vadd.f32 %v1045_v29, %v881_v7 }
 0x14e   : > { %v986_v32 = vpop.f32.mrf.mxu0  ;;  %v1047_v33 = vpop.f32.mrf.mxu1 }
 0x150   : > { %v987_v34 = vpop.f32.mrf.mxu0  ;;  %v1048_v57 = vpop.f32.mrf.mxu1 }
 0x152   : > { %v1141_v35 = vpop.f32.mrf.mxu0  ;;  %v1202_v59 = vpop.f32.mrf.mxu1 }
 0x153   : > { %v2589_v36 = vadd.f32 %v1141_v35, %v1050_v61  ;;  %v2591_v37 = vadd.f32 %v1202_v59, %v1052_v47 }
 0x154   : > { %v1143_v38 = vpop.f32.mrf.mxu0  ;;  %v1204_v23 = vpop.f32.mrf.mxu1 }
 0x155   : > { %v2593_v39 = vadd.f32 %v1143_v38, %v1051_v60  ;;  %v2595_v40 = vadd.f32 %v1204_v23, %v1053_v63 }
 0x156   : > { %v1145_v41 = vpop.f32.mrf.mxu0  ;;  %v1206_v42 = vpop.f32.mrf.mxu1 }
 0x157   : > { %v2597_v44 = vadd.f32 %v1145_v41, %v1054_v1  ;;  %v2599_v45 = vadd.f32 %v1206_v42, %v1056_v2 }
 0x158   : > { %v1147_v46 = vpop.f32.mrf.mxu0  ;;  %v1208_v48 = vpop.f32.mrf.mxu1 }
 0x159   : > { %v2601_v50 = vadd.f32 %v1147_v46, %v1055_v6  ;;  %v2603_v7 = vadd.f32 %v1208_v48, %v1057_v8 }
 0x15a   : > { %v1151_v49 = vpop.f32.mrf.mxu0  ;;  %v1212_v52 = vpop.f32.mrf.mxu1 }
 0x15b   : > { %v2605_v51 = vadd.f32 %v1151_v49, %v1058_v20  ;;  %v2607_v53 = vadd.f32 %v1212_v52, %v1060_v12 }
 0x15c   : > { %v1153_v54 = vpop.f32.mrf.mxu0  ;;  %v1214_v55 = vpop.f32.mrf.mxu1 }
 0x15d   : > { %v2609_v61 = vadd.f32 %v1153_v54, %v1059_v15  ;;  %v2611_v47 = vadd.f32 %v1214_v55, %v1061_v16 }
 0x15e   : > { %v1155_v56 = vpop.f32.mrf.mxu0  ;;  %v1216_v62 = vpop.f32.mrf.mxu1 }
 0x15f   : > { %v2613_v60 = vadd.f32 %v1155_v56, %v1062_v22  ;;  %v2615_v63 = vadd.f32 %v1216_v62, %v1064_v18 }
 0x160   : > { %v1157_v0 = vpop.f32.mrf.mxu0  ;;  %v1218_v43 = vpop.f32.mrf.mxu1 }
 0x161   : > { %v2617_v1 = vadd.f32 %v1157_v0, %v1063_v25  ;;  %v2619_v2 = vadd.f32 %v1218_v43, %v1065_v26 }
 0x162   : > { %v1161_v58 = vpop.f32.mrf.mxu0  ;;  %v1222_v3 = vpop.f32.mrf.mxu1 }
 0x163   : > { %v2621_v6 = vadd.f32 %v1161_v58, %v1066_v5  ;;  %v2623_v8 = vadd.f32 %v1222_v3, %v1068_v17  ;;  %v1818_v58 = vlaneseq }
 0x164   : > { %v1163_v9 = vpop.f32.mrf.mxu0  ;;  %v1224_v10 = vpop.f32.mrf.mxu1 }
 0x165   : > { %v2625_v20 = vadd.f32 %v1163_v9, %v1067_v30  ;;  %v2627_v12 = vadd.f32 %v1224_v10, %v1069_v31 }
 0x166   : > { %v1165_v13 = vpop.f32.mrf.mxu0  ;;  %v1226_v14 = vpop.f32.mrf.mxu1 }
 0x167   : > { %2804 = vst [vmem:[#allocation2_spill] sm:$0xff] %v2625_v20  ;;  %2805 = vst [vmem:[#allocation3_spill] sm:$0xff] %v2627_v12  ;;  %v1819_v14 = vshrl.u32 %v1818_v58, 7 }
 0x168   : > { %v1166_v15 = vpop.f32.mrf.mxu0  ;;  %v1227_v16 = vpop.f32.mrf.mxu1 }
 0x16a   : > { %v1326_v4 = vpop.f32.mrf.mxu0  ;;  %v1387_v21 = vpop.f32.mrf.mxu1 }
 0x16c   : > { %v1328_v22 = vpop.f32.mrf.mxu0  ;;  %v1389_v18 = vpop.f32.mrf.mxu1 }
 0x16d   : > { %v1415_v20 = vadd.f32 %v1328_v22, %v2593_v39 }
 0x16e   : > { %v2629_v11 = vpop.f32.mrf.mxu0  ;;  %v2631_v24 = vpop.f32.mrf.mxu1 }
 0x170   : > { %v2633_v25 = vpop.f32.mrf.mxu0  ;;  %v2635_v26 = vpop.f32.mrf.mxu1 }
 0x171   : > { %v1421_v39 = vadd.f32 %v2635_v26, %v2603_v7 }
 0x172   : > { %v2637_v27 = vpop.f32.mrf.mxu0  ;;  %v2639_v28 = vpop.f32.mrf.mxu1 }
 0x174   : > { %v2641_v5 = vpop.f32.mrf.mxu0  ;;  %v2643_v17 = vpop.f32.mrf.mxu1 }
 0x176   : > { %v2645_v19 = vpop.f32.mrf.mxu0  ;;  %v2647_v29 = vpop.f32.mrf.mxu1 }
 0x178   : > { %v2649_v30 = vpop.f32.mrf.mxu0  ;;  %v2651_v31 = vpop.f32.mrf.mxu1 }
 0x17a   : > { %v2653_v32 = vpop.f32.mrf.mxu0  ;;  %v2655_v33 = vpop.f32.mrf.mxu1 }
 0x17c   : > { %v2657_v34 = vpop.f32.mrf.mxu0  ;;  %v2659_v57 = vpop.f32.mrf.mxu1 }
 0x17d   : > { %2806 = vst [vmem:[#allocation4_spill] sm:$0xff] %v2657_v34  ;;  %2807 = vst [vmem:[#allocation5_spill] sm:$0xff] %v2659_v57  ;;  %v1832_v57 = vsub.s32 3, %v1819_v14 }
 0x17e   : > { %v1350_v35 = vpop.f32.mrf.mxu0  ;;  %v1411_v59 = vpop.f32.mrf.mxu1 }
 0x180   : > { %v1351_v38 = vpop.f32.mrf.mxu0  ;;  %v1412_v23 = vpop.f32.mrf.mxu1 }
 0x181   : > { %v1820_v38 = vsub.s32 0, %v1819_v14  ;;  %v1828_v23 = vsub.s32 2, %v1819_v14 }
 0x182   : > { %v1527_v41 = vpop.f32.mrf.mxu0  ;;  %v1588_v42 = vpop.f32.mrf.mxu1 }
 0x184   : > { %v1529_v46 = vpop.f32.mrf.mxu0  ;;  %v1590_v48 = vpop.f32.mrf.mxu1 }
 0x186   : > { %v2661_v49 = vpop.f32.mrf.mxu0  ;;  %v2663_v52 = vpop.f32.mrf.mxu1 }
 0x188   : > { %v2665_v54 = vpop.f32.mrf.mxu0  ;;  %v2667_v55 = vpop.f32.mrf.mxu1 }
 0x18a   : > { %v2669_v56 = vpop.f32.mrf.mxu0  ;;  %v2671_v62 = vpop.f32.mrf.mxu1 }
 0x18c   : > { %v2673_v0 = vpop.f32.mrf.mxu0  ;;  %v2675_v43 = vpop.f32.mrf.mxu1 }
 0x18d   : > { %2808 = vst [vmem:[#allocation6_spill] sm:$0xff] %v2675_v43  ;;  %v1417_v43 = vadd.f32 %v1389_v18, %v2595_v40 }
 0x18e   : > { %v2677_v3 = vpop.f32.mrf.mxu0  ;;  %v2679_v9 = vpop.f32.mrf.mxu1 }
 0x18f   : > { %2809 = vst [vmem:[#allocation7_spill] sm:$0xff] %v2677_v3  ;;  %2810 = vst [vmem:[#allocation8_spill] sm:$0xff] %v2679_v9  ;;  %v1824_v3 = vsub.s32 1, %v1819_v14  ;;  %v1414_v9 = vadd.f32 %v1326_v4, %v2589_v36  ;;  %v1418_v36 = vadd.f32 %v2629_v11, %v2597_v44  ;;  %v1618_v22 = vadd.f32 %v1590_v48, %v1417_v43 }
 0x190   : > { %v2681_v10 = vpop.f32.mrf.mxu0  ;;  %v2683_v13 = vpop.f32.mrf.mxu1  ;;  %v1424_v44 = vadd.f32 %v2639_v28, %v2607_v53  ;;  %v1427_v53 = vadd.f32 %v2649_v30, %v2617_v1  ;;  %v1622_v1 = vadd.f32 %v2667_v55, %v1421_v39 }
 0x191   : > { %2811 = vst [vmem:[#allocation9_spill] sm:$0xff] %v2681_v10  ;;  %2812 = vst [vmem:[#allocation10_spill] sm:$0xff] %v2683_v13  ;;  %v1816_v10 = vld [vmem:[%s2802_s2] sm:$0xf]  ;;  %v1619_v26 = vadd.f32 %v2661_v49, %v1418_v36 }
 0x192   : > { %v2687_v15 = vpop.f32.mrf.mxu0  ;;  %v2689_v16 = vpop.f32.mrf.mxu1  ;;  %v2704_v34 = vrot.slane %v1816_v10, %v1824_v3  ;;  %v2706_v14 = vrot.slane %v1816_v10, %v1832_v57 }
 0x193   : > { %2813 = vst [vmem:[#allocation11_spill] sm:$0xff] %v2687_v15  ;;  %2814 = vst [vmem:[#allocation12_spill] sm:$0xff] %v2689_v16  ;;  %v1416_v15 = vadd.f32 %v1387_v21, %v2591_v37  ;;  %v1420_v37 = vadd.f32 %v2631_v24, %v2599_v45  ;;  %v1616_v21 = vadd.f32 %v1529_v46, %v1415_v20 }
 0x194   : > { %v2691_v35 = vpop.f32.mrf.mxu0  ;;  %v2693_v59 = vpop.f32.mrf.mxu1  ;;  %v1423_v45 = vadd.f32 %v2641_v5, %v2609_v61  ;;  %v1426_v20 = vadd.f32 %v2645_v19, %v2613_v60  ;;  %v1428_v24 = vadd.f32 %v2647_v29, %v2615_v63  ;;  %v1429_v61 = vadd.f32 %v2651_v31, %v2619_v2 }
 0x195   : > { %2815 = vst [vmem:[#allocation13_spill] sm:$0xff] %v2691_v35  ;;  %2816 = vst [vmem:[#allocation14_spill] sm:$0xff] %v2693_v59  ;;  %v2700_v35 = vrot.slane %v1816_v10, %v1820_v38  ;;  %v2702_v59 = vrot.slane %v1816_v10, %v1828_v23  ;;  %v1625_v46 = vadd.f32 %v2671_v62, %v1424_v44 }
 0x196   : > { %v1551_v58 = vpop.f32.mrf.mxu0  ;;  %v1612_v13 = vpop.f32.mrf.mxu1  ;;  %v1624_v10 = vadd.f32 %v2673_v0, %v1423_v45  ;;  %v2820_v0 = vld [vmem:[#allocation3_spill] sm:$0xff] }
 0x197   : > { %v1615_v58 = vadd.f32 %v1527_v41, %v1414_v9  ;;  %v1617_v13 = vadd.f32 %v1588_v42, %v1416_v15  ;;  %v1422_v41 = vadd.f32 %v2637_v27, %v2605_v51  ;;  %v2817_v15 = vld [vmem:[#allocation6_spill] sm:$0xff] }
 0x198   : > { %v1552_v16 = vpop.f32.mrf.mxu0  ;;  %v1613_v12 = vpop.f32.mrf.mxu1 }
 0x199   : > { %v1419_v12 = vadd.f32 %v2633_v25, %v2601_v50  ;;  %v1425_v50 = vadd.f32 %v2643_v17, %v2611_v47  ;;  %v1621_v47 = vadd.f32 %v2663_v52, %v1420_v37  ;;  %v1623_v42 = vadd.f32 %v2669_v56, %v1422_v41  ;;  %v2821_v37 = vld [vmem:[#allocation5_spill] sm:$0xff] }
 0x19a   : > { %v1708_v4 = vpop.f32.mrf.mxu0  ;;  %v1769_v40 = vpop.f32.mrf.mxu1  ;;  %v1430_v52 = vadd.f32 %v2653_v32, %v2621_v6 }
 0x19b   : > { %v1796_v18 = vadd.f32 %v1708_v4, %v1615_v58  ;;  %v1798_v57 = vadd.f32 %v1769_v40, %v1617_v13  ;;  %v1620_v19 = vadd.f32 %v2665_v54, %v1419_v12  ;;  %v1432_v54 = vadd.f32 %v2655_v33, %v2623_v8  ;;  %v2818_v58 = vld [vmem:[#allocation2_spill] sm:$0xff]  ;;  %v2819_v13 = vld [vmem:[#allocation4_spill] sm:$0xff]  ;;  %v2822_v40 = vld [vmem:[#allocation7_spill] sm:$0xff] }
 0x19c   : > { %v1710_v11 = vpop.f32.mrf.mxu0  ;;  %v1771_v7 = vpop.f32.mrf.mxu1  ;;  %v1626_v16 = vadd.f32 %v2817_v15, %v1425_v50  ;;  %v1431_v36 = vadd.f32 %v2819_v13, %v2818_v58  ;;  %v1433_v12 = vadd.f32 %v2821_v37, %v2820_v0 }
 0x19d   : > { %v1797_v25 = vadd.f32 %v1710_v11, %v1616_v21  ;;  %v1799_v51 = vadd.f32 %v1771_v7, %v1618_v22  ;;  %v1838_v60 = vadd.f32 %v2700_v35, %v1796_v18  ;;  %v1840_v5 = vadd.f32 %v2702_v59, %v1798_v57  ;;  %v2823_v22 = vld [vmem:[#allocation8_spill] sm:$0xff] }
 0x19e   : > { %v1712_v27 = vpop.f32.mrf.mxu0  ;;  %v1773_v28 = vpop.f32.mrf.mxu1  ;;  %v1627_v21 = vadd.f32 %v2822_v40, %v1426_v20  ;;  %v1629_v18 = vadd.f32 %v2823_v22, %v1428_v24 }
 0x19f   : > { %v1839_v63 = vadd.f32 %v2704_v34, %v1797_v25  ;;  %v1841_v17 = vadd.f32 %v2706_v14, %v1799_v51  ;;  %v1800_v2 = vadd.f32 %v1712_v27, %v1619_v26  ;;  %v1802_v29 = vadd.f32 %v1773_v28, %v1621_v47  ;;  %v2824_v51 = vld [vmem:[#allocation9_spill] sm:$0xff]  ;;  %v2825_v47 = vld [vmem:[#allocation10_spill] sm:$0xff] }
 0x1a0   : > { %v1714_v30 = vpop.f32.mrf.mxu0  ;;  %v1775_v31 = vpop.f32.mrf.mxu1  ;;  %v1628_v26 = vadd.f32 %v2824_v51, %v1427_v53  ;;  %v1630_v27 = vadd.f32 %v2825_v47, %v1429_v61 }
 0x1a1   : > { %v2132_v48 = vpack.c.bf16 %v1839_v63, %v1838_v60  ;;  %v2133_v49 = vpack.c.bf16 %v1841_v17, %v1840_v5  ;;  %v1801_v55 = vadd.f32 %v1714_v30, %v1620_v19  ;;  %v1803_v43 = vadd.f32 %v1775_v31, %v1622_v1  ;;  %v2826_v5 = vld [vmem:[#allocation11_spill] sm:$0xff]  ;;  %v2827_v17 = vld [vmem:[#allocation12_spill] sm:$0xff] }
 0x1a2   : > { %v1718_v3 = vpop.f32.mrf.mxu0  ;;  %v1779_v9 = vpop.f32.mrf.mxu1  ;;  %v1842_v38 = vadd.f32 %v2700_v35, %v1800_v2  ;;  %v1844_v23 = vadd.f32 %v2702_v59, %v1802_v29  ;;  %v1631_v63 = vadd.f32 %v2826_v5, %v1430_v52  ;;  %v1633_v19 = vadd.f32 %v2827_v17, %v1432_v54 }
 0x1a3   : > { %1922 = vst [vmem:[%s2749_s9] sm:$0xff] %v2132_v48  ;;  %1923 = vst [vmem:[%s2749_s9 + $0x8] sm:$0xff] %v2133_v49  ;;  %v1804_v56 = vadd.f32 %v1718_v3, %v1623_v42  ;;  %v1806_v62 = vadd.f32 %v1779_v9, %v1625_v46  ;;  %v1843_v6 = vadd.f32 %v2704_v34, %v1801_v55  ;;  %v2828_v42 = vld [vmem:[#allocation13_spill] sm:$0xff]  ;;  %v2829_v46 = vld [vmem:[#allocation14_spill] sm:$0xff] }
 0x1a4   : > { %v1845_v8 = vadd.f32 %v2706_v14, %v1803_v43  ;;  %v1720_v32 = vpop.f32.mrf.mxu0  ;;  %v1781_v33 = vpop.f32.mrf.mxu1  ;;  %v1632_v61 = vadd.f32 %v2828_v42, %v1431_v36  ;;  %v1634_v48 = vadd.f32 %v2829_v46, %v1433_v12 }
 0x1a5   : > { %v1805_v39 = vadd.f32 %v1720_v32, %v1624_v10  ;;  %v1807_v4 = vadd.f32 %v1781_v33, %v1626_v16  ;;  %v2134_v57 = vpack.c.bf16 %v1843_v6, %v1842_v38  ;;  %v1846_v50 = vadd.f32 %v2700_v35, %v1804_v56 }
 0x1a6   : > { %v2135_v41 = vpack.c.bf16 %v1845_v8, %v1844_v23  ;;  %v1722_v44 = vpop.f32.mrf.mxu0  ;;  %v1783_v45 = vpop.f32.mrf.mxu1  ;;  %v1848_v11 = vadd.f32 %v2702_v59, %v1806_v62 }
 0x1a7   : > { %v1847_v7 = vadd.f32 %v2704_v34, %v1805_v39  ;;  %v1849_v25 = vadd.f32 %v2706_v14, %v1807_v4  ;;  %1924 = vst [vmem:[%s2749_s9 + $0x10] sm:$0xff] %v2134_v57  ;;  %v1808_v20 = vadd.f32 %v1722_v44, %v1627_v21  ;;  %v1810_v24 = vadd.f32 %v1783_v45, %v1629_v18 }
 0x1a8   : > { %1925 = vst [vmem:[%s2749_s9 + $0x18] sm:$0xff] %v2135_v41  ;;  %v1724_v28 = vpop.f32.mrf.mxu0  ;;  %v1785_v60 = vpop.f32.mrf.mxu1 }
 0x1a9   : > { %v2136_v1 = vpack.c.bf16 %v1847_v7, %v1846_v50  ;;  %v2137_v2 = vpack.c.bf16 %v1849_v25, %v1848_v11  ;;  %v1809_v29 = vadd.f32 %v1724_v28, %v1628_v26  ;;  %v1811_v30 = vadd.f32 %v1785_v60, %v1630_v27 }
 0x1aa   : > { %v1728_v31 = vpop.f32.mrf.mxu0  ;;  %v1789_v53 = vpop.f32.mrf.mxu1  ;;  %v1850_v43 = vadd.f32 %v2700_v35, %v1808_v20  ;;  %v1852_v52 = vadd.f32 %v2702_v59, %v1810_v24 }
 0x1ab   : > { %1926 = vst [vmem:[%s2749_s9 + $0x20] sm:$0xff] %v2136_v1  ;;  %1927 = vst [vmem:[%s2749_s9 + $0x28] sm:$0xff] %v2137_v2  ;;  %v1812_v49 = vadd.f32 %v1728_v31, %v1631_v63  ;;  %v1814_v55 = vadd.f32 %v1789_v53, %v1633_v19  ;;  %v1851_v54 = vadd.f32 %v2704_v34, %v1809_v29 }
 0x1ac   : > { %v1853_v3 = vadd.f32 %v2706_v14, %v1811_v30  ;;  %v1730_v9 = vpop.f32.mrf.mxu0  ;;  %v1791_v10 = vpop.f32.mrf.mxu1 }
 0x1ad   : > { %v1813_v15 = vadd.f32 %v1730_v9, %v1632_v61  ;;  %v1815_v16 = vadd.f32 %v1791_v10, %v1634_v48  ;;  %v2138_v56 = vpack.c.bf16 %v1851_v54, %v1850_v43  ;;  %v1854_v6 = vadd.f32 %v2700_v35, %v1812_v49 }
 0x1ae   : > { %v2139_v62 = vpack.c.bf16 %v1853_v3, %v1852_v52  ;;  %v1732_v38 = vpop.f32.mrf.mxu0  ;;  %v1793_v23 = vpop.f32.mrf.mxu1  ;;  %v1856_v8 = vadd.f32 %v2702_v59, %v1814_v55 }
 0x1af   : > { %v1855_v32 = vadd.f32 %v2704_v34, %v1813_v15  ;;  %v1857_v33 = vadd.f32 %v2706_v14, %v1815_v16  ;;  %1928 = vst [vmem:[%s2749_s9 + $0x30] sm:$0xff] %v2138_v56 }
 0x1b0   : > { %1929 = vst [vmem:[%s2749_s9 + $0x38] sm:$0xff] %v2139_v62  ;;  %v1733_v58 = vpop.f32.mrf.mxu0  ;;  %v1794_v13 = vpop.f32.mrf.mxu1 }
 0x1b1   : > { %v2140_v36 = vpack.c.bf16 %v1855_v32, %v1854_v6  ;;  %v2141_v0 = vpack.c.bf16 %v1857_v33, %v1856_v8 }
 0x1b3   : > { %1930 = vst [vmem:[%s2749_s9 + $0x40] sm:$0xff] %v2140_v36  ;;  %1931 = vst [vmem:[%s2749_s9 + $0x48] sm:$0xff] %v2141_v0 }
 0x1b4 PF: > { %s13_s12 = sadd.s32 1, %s2201_s12  }
 0x1b5   : > { %p10_p4 = scmp.ge.s32.totalorder %s13_s12, 4  }
 0x1b7   :  { %12 = sbr.rel (!%p10_p4) target bundleno = 1 (0x1), region = 68 }

</bundles_post_ra>
